<compile_context>
chip_gen: v7x
topology: tpu7x:2x2x1
jax: 0.10.0
libtpu: 0.0.40
codegen_flags: <defaults>
</compile_context>

<pallas_src>
import math
import functools

import jax
import jax.numpy as jnp
from jax import lax
from jax.experimental import pallas as pl
from jax.experimental.pallas import tpu as pltpu


def _round_up(x, m):
    return (x + m - 1) // m * m


def gru_chunk_kernel(gi_ref, h0_ref, whh_t_ref, bhn_ref, out_ref, h_scratch,
                     *, chunk, hp, unroll):
    """One grid step == one CHUNK of time steps for one batch tile.

    gi_ref   : [CHUNK, TB, 3*Hp]  precomputed x-projection + folded biases
    h0_ref   : [TB, Hp]           initial hidden state for this batch tile
    whh_t_ref: [Hp, 3*Hp]         hidden->hidden weights, gate-slab aligned
    bhn_ref  : [1, Hp]            b_hn (only bias that cannot be folded)
    out_ref  : [CHUNK, TB, Hp]    hidden states for this chunk
    h_scratch: [TB, Hp] f32       hidden state carried across time chunks
    """
    c = pl.program_id(1)  # time-chunk index (sequential / "arbitrary")

    @pl.when(c == 0)
    def _():
        h_scratch[...] = h0_ref[...].astype(jnp.float32)

    w = whh_t_ref[...]          # resident recurrent weights (f32 or bf16)
    tb = h_scratch.shape[0]
    # Hoisted out of the unrolled loop: JAX does not CSE broadcast_in_dim.
    b_hn = jnp.broadcast_to(bhn_ref[...], (tb, hp))

    def step(k, h):
        gi = gi_ref[k].astype(jnp.float32)                       # [TB, 3*Hp]
        hh = jnp.dot(h.astype(w.dtype), w,
                     preferred_element_type=jnp.float32)         # [TB, 3*Hp]
        # sigmoid(x) == 0.5*tanh(0.5*x)+0.5 : single EUP op per gate.
        r = 0.5 * jnp.tanh(0.5 * (gi[:, 0:hp] + hh[:, 0:hp])) + 0.5
        z = 0.5 * jnp.tanh(0.5 * (gi[:, hp:2 * hp] + hh[:, hp:2 * hp])) + 0.5
        n = jnp.tanh(gi[:, 2 * hp:3 * hp] + r * (hh[:, 2 * hp:3 * hp] + b_hn))
        h_new = n + z * (h - n)                                  # [TB, Hp]
        out_ref[k] = h_new.astype(out_ref.dtype)
        return h_new

    h = lax.fori_loop(0, chunk, step, h_scratch[...], unroll=unroll)
    h_scratch[...] = h


def generic_rnn_gru_forward(x, initial_state, w_ih, w_hh, b_ih, b_hh, *,
                            time_chunk=8, batch_tile=128,
                            recurrent_dtype=jnp.bfloat16, gi_dtype=None,
                            lane_align=128, min_batch_tiles=1, unroll=True):
    """GenericRNN('gru', batch_first=True).forward(x, initial_state) in Pallas.

    x:  [B, T, I] float32 (batch_first)
    initial_state: (h0,) with h0 [1, B, H]
    Returns (hidden [B, T, H], (hT [1, B, H],)).

    Tuning knobs (see header comment): recurrent_dtype / gi_dtype (bf16
    default), lane_align (256 on v6e/v7x for small H), min_batch_tiles
    (2 on v7x), time_chunk (16 on v5e), batch_tile (256 when B >= 256).
    """
    (h0,) = initial_state
    B, T, I = x.shape
    H = h0.shape[-1]
    assert T >= 1  # TODO(synk): degenerate T == 0 not supported

    if gi_dtype is None:
        gi_dtype = recurrent_dtype

    f32 = jnp.float32

    # ---- padded / tiled sizes ----
    Hp = _round_up(H, lane_align)                # lane-aligned hidden
    chunk = max(1, int(time_chunk))
    Tp = _round_up(T, chunk)

    TB = min(_round_up(B, 8), _round_up(batch_tile, 8))
    Bp = _round_up(B, TB)
    # v7x: ensure the "parallel" batch axis has >= min_batch_tiles tiles so
    # both TensorCores get work (only possible when the batch spans >= 2
    # sublane tiles).
    if min_batch_tiles > 1 and Bp // TB < min_batch_tiles and TB > 8:
        TB = max(8, _round_up(-(-Bp // min_batch_tiles), 8))
        Bp = _round_up(B, TB)

    # ---- hoisted input projection: one big XLA matmul, emitted time-major
    # and gate-slab aligned (no transpose of the largest tensor) ----
    # Fold b_hr, b_hz into the r/z slabs of the input bias; keep b_hn apart.
    w_ih_p = jnp.pad(w_ih.reshape(3, H, I), ((0, 0), (0, Hp - H), (0, 0)))
    w_ih_p = w_ih_p.reshape(3 * Hp, I).astype(f32)
    b_gi = b_ih + jnp.concatenate(
        [b_hh[:2 * H], jnp.zeros((H,), b_hh.dtype)])
    b_gi = jnp.pad(b_gi.reshape(3, H), ((0, 0), (0, Hp - H)))
    b_gi = b_gi.reshape(3 * Hp).astype(f32)

    gi_tm = jnp.einsum('bti,gi->tbg', x.astype(f32), w_ih_p,
                       preferred_element_type=f32) + b_gi        # [T, B, 3*Hp]
    gi_tm = jnp.pad(gi_tm, ((0, Tp - T), (0, Bp - B), (0, 0))).astype(gi_dtype)

    # ---- recurrent weights: transpose, gate-slab-align, pad, (bf16) ----
    w3t = jnp.transpose(w_hh.reshape(3, H, H), (0, 2, 1))        # [3, in, out]
    w3t = jnp.pad(w3t, ((0, 0), (0, Hp - H), (0, Hp - H)))
    whh_t_p = jnp.transpose(w3t, (1, 0, 2)).reshape(Hp, 3 * Hp)
    whh_t_p = whh_t_p.astype(recurrent_dtype)

    b_hn_p = jnp.pad(b_hh[2 * H:3 * H], (0, Hp - H)).reshape(1, Hp).astype(f32)
    h0_p = jnp.pad(h0.reshape(B, H).astype(f32),
                   ((0, Bp - B), (0, Hp - H)))                    # [Bp, Hp]

    # ---- explicit VMEM budget sized from the actual block footprint ----
    def _nbytes(dt):
        return jnp.dtype(dt).itemsize

    footprint = (
        2 * chunk * TB * 3 * Hp * _nbytes(gi_dtype)      # GI blocks (x2 bufs)
        + 2 * chunk * TB * Hp * _nbytes(x.dtype)         # out blocks
        + 2 * Hp * 3 * Hp * _nbytes(recurrent_dtype)     # W_hh^T blocks
        + 2 * TB * Hp * 4 + 2 * Hp * 4                   # h0, b_hn blocks
        + TB * Hp * 4)                                   # carried-h scratch
    try:
        vmem_cap = int(pltpu.get_tpu_info().vmem_capacity_bytes)
    except Exception:  # pragma: no cover - conservative fallback (v7x = 64MiB)
        vmem_cap = 64 << 20
    vmem_limit = max(32 << 20,
                     min(int(footprint * 1.3) + (2 << 20),
                         vmem_cap - (4 << 20)))

    out_tm = pl.pallas_call(
        functools.partial(gru_chunk_kernel, chunk=chunk, hp=Hp, unroll=unroll),
        out_shape=jax.ShapeDtypeStruct((Tp, Bp, Hp), x.dtype),
        grid_spec=pltpu.PrefetchScalarGridSpec(
            num_scalar_prefetch=0,
            grid=(Bp // TB, Tp // chunk),
            in_specs=[
                pl.BlockSpec((chunk, TB, 3 * Hp), lambda b, c: (c, b, 0)),  # GI
                pl.BlockSpec((TB, Hp), lambda b, c: (b, 0)),                # h0
                pl.BlockSpec((Hp, 3 * Hp), lambda b, c: (0, 0)),            # W_hh^T
                pl.BlockSpec((1, Hp), lambda b, c: (0, 0)),                 # b_hn
            ],
            out_specs=pl.BlockSpec((chunk, TB, Hp), lambda b, c: (c, b, 0)),
            scratch_shapes=[pltpu.VMEM((TB, Hp), jnp.float32)],
        ),
        compiler_params=pltpu.CompilerParams(
            # batch tiles independent (megacore on v7x); time chunks sequential
            dimension_semantics=("parallel", "arbitrary"),
            vmem_limit_bytes=vmem_limit),
    )(gi_tm, h0_p, whh_t_p, b_hn_p)

    hidden = jnp.transpose(out_tm[:T, :B, :H], (1, 0, 2))        # [B, T, H]
    hT = hidden[:, -1].reshape(1, B, H)                          # == final h
    return hidden, (hT,)


def gru_reference(x, h0, w_ih, w_hh, b_ih, b_hh):
    """Pure-JAX reference (lax.scan) mirroring torch.nn.GRU semantics."""
    B, T, I = x.shape
    H = h0.shape[-1]
    x_tm = jnp.transpose(x, (1, 0, 2))

    def step(h, x_t):
        gi = x_t @ w_ih.T + b_ih
        gh = h @ w_hh.T + b_hh
        i_r, i_z, i_n = gi[:, :H], gi[:, H:2 * H], gi[:, 2 * H:]
        h_r, h_z, h_n = gh[:, :H], gh[:, H:2 * H], gh[:, 2 * H:]
        r = jax.nn.sigmoid(i_r + h_r)
        z = jax.nn.sigmoid(i_z + h_z)
        n = jnp.tanh(i_n + r * h_n)
        h_new = (1.0 - z) * n + z * h
        return h_new, h_new

    hT, ys = lax.scan(step, h0.reshape(B, H), x_tm)
    return jnp.transpose(ys, (1, 0, 2)), hT.reshape(1, B, H)


if __name__ == "__main__":
    # Small shapes consistent with GenericRNN forward (batch_first GRU).
    # B not a multiple of 8 and T not a multiple of the chunk exercise the
    # padding paths.
    B, T, I, H = 6, 10, 16, 32

    key = jax.random.PRNGKey(0)
    k_x, k_h0, k_wi, k_wh, k_bi, k_bh, k_x2, k_h2 = jax.random.split(key, 8)

    # PyTorch nn.GRU init: uniform(-1/sqrt(H), 1/sqrt(H)) for all params.
    bound = 1.0 / math.sqrt(H)
    x = jax.random.normal(k_x, (B, T, I), dtype=jnp.float32)
    h0 = jax.random.normal(k_h0, (1, B, H), dtype=jnp.float32)
    w_ih = jax.random.uniform(k_wi, (3 * H, I), minval=-bound, maxval=bound,
                              dtype=jnp.float32)
    w_hh = jax.random.uniform(k_wh, (3 * H, H), minval=-bound, maxval=bound,
                              dtype=jnp.float32)
    b_ih = jax.random.uniform(k_bi, (3 * H,), minval=-bound, maxval=bound,
                              dtype=jnp.float32)
    b_hh = jax.random.uniform(k_bh, (3 * H,), minval=-bound, maxval=bound,
                              dtype=jnp.float32)

    ref_hidden, ref_hT = gru_reference(x, h0, w_ih, w_hh, b_ih, b_hh)

    # --- f32 recurrent weights + f32 GI, multi-chunk time (chunk carry) ---
    fwd32 = jax.jit(functools.partial(
        generic_rnn_gru_forward, time_chunk=4, recurrent_dtype=jnp.float32))
    hidden, (hT,) = fwd32(x, (h0,), w_ih, w_hh, b_ih, b_hh)
    jax.block_until_ready(hidden)
    jax.block_until_ready(hT)
    assert hidden.shape == (B, T, H) and hT.shape == (1, B, H)
    assert jnp.allclose(hidden, ref_hidden, rtol=1e-4, atol=1e-4)
    assert jnp.allclose(hT, ref_hT, rtol=1e-4, atol=1e-4)

    # --- default bf16 recurrent weights + bf16 GI (MXU-native / low-BW path),
    # looser tolerance ---
    fwd16 = jax.jit(functools.partial(generic_rnn_gru_forward, time_chunk=8))
    hidden16, (hT16,) = fwd16(x, (h0,), w_ih, w_hh, b_ih, b_hh)
    jax.block_until_ready(hidden16)
    assert jnp.allclose(hidden16, ref_hidden, rtol=5e-2, atol=5e-2)
    assert jnp.allclose(hT16, ref_hT, rtol=5e-2, atol=5e-2)

    # --- multi-batch-tile path (min_batch_tiles=2, as on v7x megacore) ---
    B2, T2 = 20, 9
    x2 = jax.random.normal(k_x2, (B2, T2, I), dtype=jnp.float32)
    h02 = jax.random.normal(k_h2, (1, B2, H), dtype=jnp.float32)
    ref_hidden2, ref_hT2 = gru_reference(x2, h02, w_ih, w_hh, b_ih, b_hh)
    fwd_mc = jax.jit(functools.partial(
        generic_rnn_gru_forward, time_chunk=4, recurrent_dtype=jnp.float32,
        min_batch_tiles=2))
    hidden2, (hT2,) = fwd_mc(x2, (h02,), w_ih, w_hh, b_ih, b_hh)
    jax.block_until_ready(hidden2)
    assert hidden2.shape == (B2, T2, H) and hT2.shape == (1, B2, H)
    assert jnp.allclose(hidden2, ref_hidden2, rtol=1e-4, atol=1e-4)
    assert jnp.allclose(hT2, ref_hT2, rtol=1e-4, atol=1e-4)

    print("KERNEL_OK")
</pallas_src>

<mosaic_0001>
module attributes {stable_mosaic.version = 11 : i64} {
  func.func @gru_chunk_kernel(%arg0: i32, %arg1: i32, %arg2: memref<4x8x384xf32, #tpu.memory_space<vmem>>, %arg3: memref<8x128xf32, #tpu.memory_space<vmem>>, %arg4: memref<128x384xf32, #tpu.memory_space<vmem>>, %arg5: memref<1x128xf32, #tpu.memory_space<vmem>>, %arg6: memref<4x8x128xf32, #tpu.memory_space<vmem>>, %arg7: memref<8x128xf32, #tpu.memory_space<vmem>>) attributes {dimension_semantics = [#tpu.dimension_semantics<parallel>, #tpu.dimension_semantics<arbitrary>], iteration_bounds = array<i64: 1, 3>, scalar_prefetch = 0 : i64, scratch_operands = 1 : i64, tpu.core_type = #tpu.core_type<tc>, window_params = [{transform_indices = @transform_0, window_bounds = array<i64: 4, 8, 384>}, {transform_indices = @transform_1, window_bounds = array<i64: 8, 128>}, {pipeline_mode = #tpu.pipeline_mode<synchronous>, transform_indices = @transform_2, window_bounds = array<i64: 128, 384>}, {pipeline_mode = #tpu.pipeline_mode<synchronous>, transform_indices = @transform_3, window_bounds = array<i64: 1, 128>}, {transform_indices = @transform_4, window_bounds = array<i64: 4, 8, 128>}]} {
    %c0_i32 = arith.constant 0 : i32
    %0 = arith.cmpi eq, %arg1, %c0_i32 : i32
    %1 = arith.extui %0 : i1 to i32
    %c0_i32_0 = arith.constant 0 : i32
    %2 = arith.cmpi ne, %1, %c0_i32_0 : i32
    scf.if %2 {
      %c0_52 = arith.constant 0 : index
      %c0_53 = arith.constant 0 : index
      %157 = vector.load %arg3[%c0_52, %c0_53] : memref<8x128xf32, #tpu.memory_space<vmem>>, vector<8x128xf32>
      %c0_54 = arith.constant 0 : index
      %c0_55 = arith.constant 0 : index
      %158 = vector.load %arg7[%c0_54, %c0_55] : memref<8x128xf32, #tpu.memory_space<vmem>>, vector<8x128xf32>
      tpu.vector_store %arg7[%c0_54, %c0_55], %157 {strides = array<i32>} : memref<8x128xf32, #tpu.memory_space<vmem>>, vector<8x128xf32>,
    } else {
    }
    %c0 = arith.constant 0 : index
    %c0_1 = arith.constant 0 : index
    %3 = vector.load %arg4[%c0, %c0_1] : memref<128x384xf32, #tpu.memory_space<vmem>>, vector<128x384xf32>
    %c0_2 = arith.constant 0 : index
    %c0_3 = arith.constant 0 : index
    %4 = vector.load %arg5[%c0_2, %c0_3] : memref<1x128xf32, #tpu.memory_space<vmem>>, vector<1x128xf32>
    %5 = vector.shape_cast %4 : vector<1x128xf32> to vector<1x128xf32>
    %6 = vector.broadcast %5 : vector<1x128xf32> to vector<8x128xf32>
    %c0_4 = arith.constant 0 : index
    %c0_5 = arith.constant 0 : index
    %7 = vector.load %arg7[%c0_4, %c0_5] : memref<8x128xf32, #tpu.memory_space<vmem>>, vector<8x128xf32>
    %c0_i32_6 = arith.constant 0 : i32
    %8 = arith.index_cast %c0_i32_6 : i32 to index
    %c0_7 = arith.constant 0 : index
    %c0_8 = arith.constant 0 : index
    %9 = vector.load %arg2[%8, %c0_7, %c0_8] : memref<4x8x384xf32, #tpu.memory_space<vmem>>, vector<1x8x384xf32>
    %10 = vector.shape_cast %9 : vector<1x8x384xf32> to vector<8x384xf32>
    %cst = arith.constant dense<0.000000e+00> : vector<8x384xf32>
    %11 = tpu.matmul %7, %3, %cst {dimension_numbers = #tpu.dot_dimension_numbers<[1], [0], [0], [1], [0, 0, 1, 1], [], []>} : vector<8x128xf32>, vector<128x384xf32>, vector<8x384xf32> -> vector<8x384xf32>
    %12 = vector.extract_strided_slice %10 {offsets = [0, 0], sizes = [8, 128], strides = [1, 1]} : vector<8x384xf32> to vector<8x128xf32>
    %13 = vector.extract_strided_slice %11 {offsets = [0, 0], sizes = [8, 128], strides = [1, 1]} : vector<8x384xf32> to vector<8x128xf32>
    %14 = arith.addf %12, %13 : vector<8x128xf32>
    %cst_9 = arith.constant 5.000000e-01 : f32
    %15 = vector.broadcast %cst_9 : f32 to vector<8x128xf32>
    %16 = arith.mulf %15, %14 : vector<8x128xf32>
    %17 = math.tanh %16 : vector<8x128xf32>
    %cst_10 = arith.constant 5.000000e-01 : f32
    %18 = vector.broadcast %cst_10 : f32 to vector<8x128xf32>
    %19 = arith.mulf %18, %17 : vector<8x128xf32>
    %cst_11 = arith.constant 5.000000e-01 : f32
    %20 = vector.broadcast %cst_11 : f32 to vector<8x128xf32>
    %21 = arith.addf %19, %20 : vector<8x128xf32>
    %22 = vector.extract_strided_slice %10 {offsets = [0, 128], sizes = [8, 128], strides = [1, 1]} : vector<8x384xf32> to vector<8x128xf32>
    %23 = vector.extract_strided_slice %11 {offsets = [0, 128], sizes = [8, 128], strides = [1, 1]} : vector<8x384xf32> to vector<8x128xf32>
    %24 = arith.addf %22, %23 : vector<8x128xf32>
    %cst_12 = arith.constant 5.000000e-01 : f32
    %25 = vector.broadcast %cst_12 : f32 to vector<8x128xf32>
    %26 = arith.mulf %25, %24 : vector<8x128xf32>
    %27 = math.tanh %26 : vector<8x128xf32>
    %cst_13 = arith.constant 5.000000e-01 : f32
    %28 = vector.broadcast %cst_13 : f32 to vector<8x128xf32>
    %29 = arith.mulf %28, %27 : vector<8x128xf32>
    %cst_14 = arith.constant 5.000000e-01 : f32
    %30 = vector.broadcast %cst_14 : f32 to vector<8x128xf32>
    %31 = arith.addf %29, %30 : vector<8x128xf32>
    %32 = vector.extract_strided_slice %10 {offsets = [0, 256], sizes = [8, 128], strides = [1, 1]} : vector<8x384xf32> to vector<8x128xf32>
    %33 = vector.extract_strided_slice %11 {offsets = [0, 256], sizes = [8, 128], strides = [1, 1]} : vector<8x384xf32> to vector<8x128xf32>
    %34 = arith.addf %33, %6 : vector<8x128xf32>
    %35 = arith.mulf %21, %34 : vector<8x128xf32>
    %36 = arith.addf %32, %35 : vector<8x128xf32>
    %37 = math.tanh %36 : vector<8x128xf32>
    %38 = arith.subf %7, %37 : vector<8x128xf32>
    %39 = arith.mulf %31, %38 : vector<8x128xf32>
    %40 = arith.addf %37, %39 : vector<8x128xf32>
    %41 = arith.index_cast %c0_i32_6 : i32 to index
    %c0_15 = arith.constant 0 : index
    %c0_16 = arith.constant 0 : index
    %42 = vector.load %arg6[%41, %c0_15, %c0_16] : memref<4x8x128xf32, #tpu.memory_space<vmem>>, vector<1x8x128xf32>
    %43 = vector.shape_cast %42 : vector<1x8x128xf32> to vector<8x128xf32>
    %44 = vector.shape_cast %40 : vector<8x128xf32> to vector<1x8x128xf32>
    tpu.vector_store %arg6[%41, %c0_15, %c0_16], %44 {strides = array<i32>} : memref<4x8x128xf32, #tpu.memory_space<vmem>>, vector<1x8x128xf32>,
    %c1_i32 = arith.constant 1 : i32
    %45 = arith.index_cast %c1_i32 : i32 to index
    %c0_17 = arith.constant 0 : index
    %c0_18 = arith.constant 0 : index
    %46 = vector.load %arg2[%45, %c0_17, %c0_18] : memref<4x8x384xf32, #tpu.memory_space<vmem>>, vector<1x8x384xf32>
    %47 = vector.shape_cast %46 : vector<1x8x384xf32> to vector<8x384xf32>
    %cst_19 = arith.constant dense<0.000000e+00> : vector<8x384xf32>
    %48 = tpu.matmul %40, %3, %cst_19 {dimension_numbers = #tpu.dot_dimension_numbers<[1], [0], [0], [1], [0, 0, 1, 1], [], []>} : vector<8x128xf32>, vector<128x384xf32>, vector<8x384xf32> -> vector<8x384xf32>
    %49 = vector.extract_strided_slice %47 {offsets = [0, 0], sizes = [8, 128], strides = [1, 1]} : vector<8x384xf32> to vector<8x128xf32>
    %50 = vector.extract_strided_slice %48 {offsets = [0, 0], sizes = [8, 128], strides = [1, 1]} : vector<8x384xf32> to vector<8x128xf32>
    %51 = arith.addf %49, %50 : vector<8x128xf32>
    %cst_20 = arith.constant 5.000000e-01 : f32
    %52 = vector.broadcast %cst_20 : f32 to vector<8x128xf32>
    %53 = arith.mulf %52, %51 : vector<8x128xf32>
    %54 = math.tanh %53 : vector<8x128xf32>
    %cst_21 = arith.constant 5.000000e-01 : f32
    %55 = vector.broadcast %cst_21 : f32 to vector<8x128xf32>
    %56 = arith.mulf %55, %54 : vector<8x128xf32>
    %cst_22 = arith.constant 5.000000e-01 : f32
    %57 = vector.broadcast %cst_22 : f32 to vector<8x128xf32>
    %58 = arith.addf %56, %57 : vector<8x128xf32>
    %59 = vector.extract_strided_slice %47 {offsets = [0, 128], sizes = [8, 128], strides = [1, 1]} : vector<8x384xf32> to vector<8x128xf32>
    %60 = vector.extract_strided_slice %48 {offsets = [0, 128], sizes = [8, 128], strides = [1, 1]} : vector<8x384xf32> to vector<8x128xf32>
    %61 = arith.addf %59, %60 : vector<8x128xf32>
    %cst_23 = arith.constant 5.000000e-01 : f32
    %62 = vector.broadcast %cst_23 : f32 to vector<8x128xf32>
    %63 = arith.mulf %62, %61 : vector<8x128xf32>
    %64 = math.tanh %63 : vector<8x128xf32>
    %cst_24 = arith.constant 5.000000e-01 : f32
    %65 = vector.broadcast %cst_24 : f32 to vector<8x128xf32>
    %66 = arith.mulf %65, %64 : vector<8x128xf32>
    %cst_25 = arith.constant 5.000000e-01 : f32
    %67 = vector.broadcast %cst_25 : f32 to vector<8x128xf32>
    %68 = arith.addf %66, %67 : vector<8x128xf32>
    %69 = vector.extract_strided_slice %47 {offsets = [0, 256], sizes = [8, 128], strides = [1, 1]} : vector<8x384xf32> to vector<8x128xf32>
    %70 = vector.extract_strided_slice %48 {offsets = [0, 256], sizes = [8, 128], strides = [1, 1]} : vector<8x384xf32> to vector<8x128xf32>
    %71 = arith.addf %70, %6 : vector<8x128xf32>
    %72 = arith.mulf %58, %71 : vector<8x128xf32>
    %73 = arith.addf %69, %72 : vector<8x128xf32>
    %74 = math.tanh %73 : vector<8x128xf32>
    %75 = arith.subf %40, %74 : vector<8x128xf32>
    %76 = arith.mulf %68, %75 : vector<8x128xf32>
    %77 = arith.addf %74, %76 : vector<8x128xf32>
    %78 = arith.index_cast %c1_i32 : i32 to index
    %c0_26 = arith.constant 0 : index
    %c0_27 = arith.constant 0 : index
    %79 = vector.load %arg6[%78, %c0_26, %c0_27] : memref<4x8x128xf32, #tpu.memory_space<vmem>>, vector<1x8x128xf32>
    %80 = vector.shape_cast %79 : vector<1x8x128xf32> to vector<8x128xf32>
    %81 = vector.shape_cast %77 : vector<8x128xf32> to vector<1x8x128xf32>
    tpu.vector_store %arg6[%78, %c0_26, %c0_27], %81 {strides = array<i32>} : memref<4x8x128xf32, #tpu.memory_space<vmem>>, vector<1x8x128xf32>,
    %c2_i32 = arith.constant 2 : i32
    %82 = arith.index_cast %c2_i32 : i32 to index
    %c0_28 = arith.constant 0 : index
    %c0_29 = arith.constant 0 : index
    %83 = vector.load %arg2[%82, %c0_28, %c0_29] : memref<4x8x384xf32, #tpu.memory_space<vmem>>, vector<1x8x384xf32>
    %84 = vector.shape_cast %83 : vector<1x8x384xf32> to vector<8x384xf32>
    %cst_30 = arith.constant dense<0.000000e+00> : vector<8x384xf32>
    %85 = tpu.matmul %77, %3, %cst_30 {dimension_numbers = #tpu.dot_dimension_numbers<[1], [0], [0], [1], [0, 0, 1, 1], [], []>} : vector<8x128xf32>, vector<128x384xf32>, vector<8x384xf32> -> vector<8x384xf32>
    %86 = vector.extract_strided_slice %84 {offsets = [0, 0], sizes = [8, 128], strides = [1, 1]} : vector<8x384xf32> to vector<8x128xf32>
    %87 = vector.extract_strided_slice %85 {offsets = [0, 0], sizes = [8, 128], strides = [1, 1]} : vector<8x384xf32> to vector<8x128xf32>
    %88 = arith.addf %86, %87 : vector<8x128xf32>
    %cst_31 = arith.constant 5.000000e-01 : f32
    %89 = vector.broadcast %cst_31 : f32 to vector<8x128xf32>
    %90 = arith.mulf %89, %88 : vector<8x128xf32>
    %91 = math.tanh %90 : vector<8x128xf32>
    %cst_32 = arith.constant 5.000000e-01 : f32
    %92 = vector.broadcast %cst_32 : f32 to vector<8x128xf32>
    %93 = arith.mulf %92, %91 : vector<8x128xf32>
    %cst_33 = arith.constant 5.000000e-01 : f32
    %94 = vector.broadcast %cst_33 : f32 to vector<8x128xf32>
    %95 = arith.addf %93, %94 : vector<8x128xf32>
    %96 = vector.extract_strided_slice %84 {offsets = [0, 128], sizes = [8, 128], strides = [1, 1]} : vector<8x384xf32> to vector<8x128xf32>
    %97 = vector.extract_strided_slice %85 {offsets = [0, 128], sizes = [8, 128], strides = [1, 1]} : vector<8x384xf32> to vector<8x128xf32>
    %98 = arith.addf %96, %97 : vector<8x128xf32>
    %cst_34 = arith.constant 5.000000e-01 : f32
    %99 = vector.broadcast %cst_34 : f32 to vector<8x128xf32>
    %100 = arith.mulf %99, %98 : vector<8x128xf32>
    %101 = math.tanh %100 : vector<8x128xf32>
    %cst_35 = arith.constant 5.000000e-01 : f32
    %102 = vector.broadcast %cst_35 : f32 to vector<8x128xf32>
    %103 = arith.mulf %102, %101 : vector<8x128xf32>
    %cst_36 = arith.constant 5.000000e-01 : f32
    %104 = vector.broadcast %cst_36 : f32 to vector<8x128xf32>
    %105 = arith.addf %103, %104 : vector<8x128xf32>
    %106 = vector.extract_strided_slice %84 {offsets = [0, 256], sizes = [8, 128], strides = [1, 1]} : vector<8x384xf32> to vector<8x128xf32>
    %107 = vector.extract_strided_slice %85 {offsets = [0, 256], sizes = [8, 128], strides = [1, 1]} : vector<8x384xf32> to vector<8x128xf32>
    %108 = arith.addf %107, %6 : vector<8x128xf32>
    %109 = arith.mulf %95, %108 : vector<8x128xf32>
    %110 = arith.addf %106, %109 : vector<8x128xf32>
    %111 = math.tanh %110 : vector<8x128xf32>
    %112 = arith.subf %77, %111 : vector<8x128xf32>
    %113 = arith.mulf %105, %112 : vector<8x128xf32>
    %114 = arith.addf %111, %113 : vector<8x128xf32>
    %115 = arith.index_cast %c2_i32 : i32 to index
    %c0_37 = arith.constant 0 : index
    %c0_38 = arith.constant 0 : index
    %116 = vector.load %arg6[%115, %c0_37, %c0_38] : memref<4x8x128xf32, #tpu.memory_space<vmem>>, vector<1x8x128xf32>
    %117 = vector.shape_cast %116 : vector<1x8x128xf32> to vector<8x128xf32>
    %118 = vector.shape_cast %114 : vector<8x128xf32> to vector<1x8x128xf32>
    tpu.vector_store %arg6[%115, %c0_37, %c0_38], %118 {strides = array<i32>} : memref<4x8x128xf32, #tpu.memory_space<vmem>>, vector<1x8x128xf32>,
    %c3_i32 = arith.constant 3 : i32
    %119 = arith.index_cast %c3_i32 : i32 to index
    %c0_39 = arith.constant 0 : index
    %c0_40 = arith.constant 0 : index
    %120 = vector.load %arg2[%119, %c0_39, %c0_40] : memref<4x8x384xf32, #tpu.memory_space<vmem>>, vector<1x8x384xf32>
    %121 = vector.shape_cast %120 : vector<1x8x384xf32> to vector<8x384xf32>
    %cst_41 = arith.constant dense<0.000000e+00> : vector<8x384xf32>
    %122 = tpu.matmul %114, %3, %cst_41 {dimension_numbers = #tpu.dot_dimension_numbers<[1], [0], [0], [1], [0, 0, 1, 1], [], []>} : vector<8x128xf32>, vector<128x384xf32>, vector<8x384xf32> -> vector<8x384xf32>
    %123 = vector.extract_strided_slice %121 {offsets = [0, 0], sizes = [8, 128], strides = [1, 1]} : vector<8x384xf32> to vector<8x128xf32>
    %124 = vector.extract_strided_slice %122 {offsets = [0, 0], sizes = [8, 128], strides = [1, 1]} : vector<8x384xf32> to vector<8x128xf32>
    %125 = arith.addf %123, %124 : vector<8x128xf32>
    %cst_42 = arith.constant 5.000000e-01 : f32
    %126 = vector.broadcast %cst_42 : f32 to vector<8x128xf32>
    %127 = arith.mulf %126, %125 : vector<8x128xf32>
    %128 = math.tanh %127 : vector<8x128xf32>
    %cst_43 = arith.constant 5.000000e-01 : f32
    %129 = vector.broadcast %cst_43 : f32 to vector<8x128xf32>
    %130 = arith.mulf %129, %128 : vector<8x128xf32>
    %cst_44 = arith.constant 5.000000e-01 : f32
    %131 = vector.broadcast %cst_44 : f32 to vector<8x128xf32>
    %132 = arith.addf %130, %131 : vector<8x128xf32>
    %133 = vector.extract_strided_slice %121 {offsets = [0, 128], sizes = [8, 128], strides = [1, 1]} : vector<8x384xf32> to vector<8x128xf32>
    %134 = vector.extract_strided_slice %122 {offsets = [0, 128], sizes = [8, 128], strides = [1, 1]} : vector<8x384xf32> to vector<8x128xf32>
    %135 = arith.addf %133, %134 : vector<8x128xf32>
    %cst_45 = arith.constant 5.000000e-01 : f32
    %136 = vector.broadcast %cst_45 : f32 to vector<8x128xf32>
    %137 = arith.mulf %136, %135 : vector<8x128xf32>
    %138 = math.tanh %137 : vector<8x128xf32>
    %cst_46 = arith.constant 5.000000e-01 : f32
    %139 = vector.broadcast %cst_46 : f32 to vector<8x128xf32>
    %140 = arith.mulf %139, %138 : vector<8x128xf32>
    %cst_47 = arith.constant 5.000000e-01 : f32
    %141 = vector.broadcast %cst_47 : f32 to vector<8x128xf32>
    %142 = arith.addf %140, %141 : vector<8x128xf32>
    %143 = vector.extract_strided_slice %121 {offsets = [0, 256], sizes = [8, 128], strides = [1, 1]} : vector<8x384xf32> to vector<8x128xf32>
    %144 = vector.extract_strided_slice %122 {offsets = [0, 256], sizes = [8, 128], strides = [1, 1]} : vector<8x384xf32> to vector<8x128xf32>
    %145 = arith.addf %144, %6 : vector<8x128xf32>
    %146 = arith.mulf %132, %145 : vector<8x128xf32>
    %147 = arith.addf %143, %146 : vector<8x128xf32>
    %148 = math.tanh %147 : vector<8x128xf32>
    %149 = arith.subf %114, %148 : vector<8x128xf32>
    %150 = arith.mulf %142, %149 : vector<8x128xf32>
    %151 = arith.addf %148, %150 : vector<8x128xf32>
    %152 = arith.index_cast %c3_i32 : i32 to index
    %c0_48 = arith.constant 0 : index
    %c0_49 = arith.constant 0 : index
    %153 = vector.load %arg6[%152, %c0_48, %c0_49] : memref<4x8x128xf32, #tpu.memory_space<vmem>>, vector<1x8x128xf32>
    %154 = vector.shape_cast %153 : vector<1x8x128xf32> to vector<8x128xf32>
    %155 = vector.shape_cast %151 : vector<8x128xf32> to vector<1x8x128xf32>
    tpu.vector_store %arg6[%152, %c0_48, %c0_49], %155 {strides = array<i32>} : memref<4x8x128xf32, #tpu.memory_space<vmem>>, vector<1x8x128xf32>,
    %c4_i32 = arith.constant 4 : i32
    %c0_50 = arith.constant 0 : index
    %c0_51 = arith.constant 0 : index
    %156 = vector.load %arg7[%c0_50, %c0_51] : memref<8x128xf32, #tpu.memory_space<vmem>>, vector<8x128xf32>
    tpu.vector_store %arg7[%c0_50, %c0_51], %151 {strides = array<i32>} : memref<8x128xf32, #tpu.memory_space<vmem>>, vector<8x128xf32>,
    return
  }
  func.func @transform_0(%arg0: i32, %arg1: i32) -> (i32, i32, i32) {
    %c0_i32 = arith.constant 0 : i32
    %c0_i32_0 = arith.constant 0 : i32
    return %arg1, %arg0, %c0_i32 : i32, i32, i32
  }
  func.func @transform_1(%arg0: i32, %arg1: i32) -> (i32, i32) {
    %c0_i32 = arith.constant 0 : i32
    %c0_i32_0 = arith.constant 0 : i32
    return %arg0, %c0_i32 : i32, i32
  }
  func.func @transform_2(%arg0: i32, %arg1: i32) -> (i32, i32) {
    %c0_i32 = arith.constant 0 : i32
    %c0_i32_0 = arith.constant 0 : i32
    %c0_i32_1 = arith.constant 0 : i32
    return %c0_i32, %c0_i32_0 : i32, i32
  }
  func.func @transform_3(%arg0: i32, %arg1: i32) -> (i32, i32) {
    %c0_i32 = arith.constant 0 : i32
    %c0_i32_0 = arith.constant 0 : i32
    %c0_i32_1 = arith.constant 0 : i32
    return %c0_i32, %c0_i32_0 : i32, i32
  }
  func.func @transform_4(%arg0: i32, %arg1: i32) -> (i32, i32, i32) {
    %c0_i32 = arith.constant 0 : i32
    %c0_i32_0 = arith.constant 0 : i32
    return %arg1, %arg0, %c0_i32 : i32, i32, i32
  }
}

</mosaic_0001>

<bundles_post_ra>
// kernel: generic_rnn_gru_forward.1
= control target key start
LH: loop header
LB: loop body
LE: loop exit
PB: predicated region body
PF: predicated region fallthrough
CT: control target
= control target key end

     0   :  { %s1633_s15 = smov 0   ;;  %s1635_s16 = smov 0   ;;  %s2041_s0 = inlined_call_operand.vmem [shape: f32[12,8,384], index: 0, kind: input, shape index: {}]   ;;  %s2042_s1 = inlined_call_operand.vmem [shape: f32[8,128], index: 1, kind: input, shape index: {}]   ;;  %s2043_s2 = inlined_call_operand.vmem [shape: f32[128,384], index: 2, kind: input, shape index: {}]   ;;  %s2044_s3 = inlined_call_operand.vmem [shape: f32[1,128], index: 3, kind: input, shape index: {}]   ;;  %s2045_s4 = inlined_call_operand.vmem [shape: f32[12,8,128], index: 4, kind: output, shape index: {}]  }
   0x1   :  { %s1637_s17 = smov 0  }
   0x2 LB: > { %s23_s18 = sadd.s32 1, %s1599_s16  ;;  %p1076_p0 = scmp.ge.s32.totalorder %s1603_s17, 1  ;;  %s1603_s17 = sphi %s1637_s17, %s14_s17   ;;  %s1599_s16 = sphi %s1635_s16, %s2047_s16   ;;  %s1595_s15 = sphi %s1633_s15, %s2046_s15  }
   0x3   : > { %p24_p1 = scmp.ge.s32.totalorder %s23_s18, 3  ;;  %p193_p2 = scmp.lt.s32.totalorder %s1603_s17, 4 }
   0x5   : > { %s2049_s18 = smov (%p24_p1, %s23_s18), 0  ;;  %p194_p3 = pnand %p1076_p0, %p193_p2 }
   0x6   : > { %s1077_s19 = sshll.u32 (!%p194_p3), %s1595_s15, 2  ;;  %p1081_p5 = scmp.ne.s32.totalorder (!%p194_p3), %s1595_s15, 0 }
   0x7   : > { %197 = sbr.rel (%p194_p3) target bundleno = 1065 (0x429), region = 36  ;;  %p232_p4 = scmp.lt.s32.totalorder (!%p194_p3), %s1077_s19, 11 }
   0xe   : > { %s2051_s19 = smov (!%p232_p4, %s1077_s19), 11  ;;  %258 = sbr.rel (%p1081_p5) target bundleno = 21 (0x15), region = 40 }
   0xf   : > { %s1529_s20 = smul.u32 24, %s2051_s19  ;;  %s1080_s21 = sshll.u32 %s2051_s19, 3  ;;  %v259_v0 = vld [vmem:[%s2042_s1] sm:$0xff] (!%p1081_p5) }
  0x10   : > { %s1654_s24 = scalar_lea.vmem %s2045_s4, %s1080_s21  ;;  %260 = vst [vmem:[#allocation2] sm:$0xff] (!%p1081_p5), %v259_v0 }
  0x11   : > { %s1659_s27 = scalar_lea.vmem %s2041_s0, %s1529_s20 }
  0x15 PF: > { %v262_v1 = vld [vmem:[%s2043_s2 + $0x8] sm:$0xff]  ;;  %v265_v2 = vld [vmem:[%s2043_s2 + $0x20] sm:$0xff]  ;;  %v264_v5 = vld [vmem:[%s2043_s2 + $0x18] sm:$0xff]  ;;  %v1605_v8 = vmov 0.0|0.0   ;;  %v1606_v9 = vmov 0.0   ;;  %vm1607_vm0 = vmmov 0  }
  0x16   : > { %v261_v3 = vld [vmem:[%s2043_s2] sm:$0xff]  ;;  %v1673_v4 = vpack.c.bf16 %v265_v2, %v262_v1  ;;  %v268_v6 = vld [vmem:[%s2043_s2 + $0x38] sm:$0xff]  ;;  %v271_v7 = vld [vmem:[%s2043_s2 + $0x50] sm:$0xff]  ;;  %1337 = vmatprep.subr.bf16.mxu1 %v1605_v8  ;;  %384 = vmatprep.mubr.f32.mxu0 %v1606_v9 }
  0x17   : > { %v1686_v10 = vpack.c.bf16 %v264_v5, %v261_v3  ;;  %v1688_v11 = vpack.c.bf16 %v271_v7, %v268_v6  ;;  %v267_v12 = vld [vmem:[%s2043_s2 + $0x30] sm:$0xff]  ;;  %v270_v13 = vld [vmem:[%s2043_s2 + $0x48] sm:$0xff]  ;;  %1197 = vmatprep.mubr.msk.f32.mxu1 %vm1607_vm0, %v1606_v9  ;;  %v277_v15 = vld [vmem:[%s2043_s2 + $0x80] sm:$0xff] }
  0x18   : > { %v274_v14 = vld [vmem:[%s2043_s2 + $0x68] sm:$0xff]  ;;  %1306 = vmatprep.subr.bf16.mxu0 %v1673_v4  ;;  %v1706_v16 = vpack.c.bf16 %v270_v13, %v267_v12  ;;  %v273_v18 = vld [vmem:[%s2043_s2 + $0x60] sm:$0xff]  ;;  %v276_v19 = vld [vmem:[%s2043_s2 + $0x78] sm:$0xff] }
  0x19   : > { %1308 = vmatpush1.bf16.msra.mxu0 %v1686_v10  ;;  %v1709_v17 = vpack.c.bf16 %v277_v15, %v274_v14  ;;  %v280_v20 = vld [vmem:[%s2043_s2 + $0x98] sm:$0xff]  ;;  %v283_v21 = vld [vmem:[%s2043_s2 + $0xb0] sm:$0xff]  ;;  %v266_v23 = vld [vmem:[%s2043_s2 + $0x28] sm:$0xff]  ;;  %v1730_v24 = vpack.c.bf16 %v276_v19, %v273_v18 }
  0x1a   : > { %1310 = vmatprep.subr.bf16.mxu0 %v1688_v11  ;;  %v263_v22 = vld [vmem:[%s2043_s2 + $0x10] sm:$0xff]  ;;  %v269_v26 = vld [vmem:[%s2043_s2 + $0x40] sm:$0xff]  ;;  %v1738_v27 = vpack.c.bf16 %v283_v21, %v280_v20  ;;  %v282_v29 = vld [vmem:[%s2043_s2 + $0xa8] sm:$0xff] }
  0x1b   : > { %v1732_v25 = vpack.c.bf16 %v266_v23, %v263_v22  ;;  %v279_v28 = vld [vmem:[%s2043_s2 + $0x90] sm:$0xff]  ;;  %v272_v30 = vld [vmem:[%s2043_s2 + $0x58] sm:$0xff]  ;;  %v286_v31 = vld [vmem:[%s2043_s2 + $0xc8] sm:$0xff] }
  0x1c   : > { %v289_v32 = vld [vmem:[%s2043_s2 + $0xe0] sm:$0xff]  ;;  %v1756_v33 = vpack.c.bf16 %v272_v30, %v269_v26  ;;  %v275_v34 = vld [vmem:[%s2043_s2 + $0x70] sm:$0xff]  ;;  %v278_v35 = vld [vmem:[%s2043_s2 + $0x88] sm:$0xff]  ;;  %v1766_v36 = vpack.c.bf16 %v282_v29, %v279_v28 }
  0x1d   : > { %1312 = vmatpush1.bf16.msra.mxu0 %v1706_v16  ;;  %1339 = vmatpush3.bf16.msra.mxu1 %v1732_v25  ;;  %v1769_v37 = vpack.c.bf16 %v289_v32, %v286_v31  ;;  %v285_v38 = vld [vmem:[%s2043_s2 + $0xc0] sm:$0xff]  ;;  %v288_v39 = vld [vmem:[%s2043_s2 + $0xd8] sm:$0xff]  ;;  %v295_v41 = vld [vmem:[%s2043_s2 + $0x110] sm:$0xff]  ;;  %v1784_v42 = vpack.c.bf16 %v278_v35, %v275_v34 }
  0x1e   : > { %1314 = vmatprep.subr.bf16.mxu0 %v1709_v17  ;;  %1340 = vmatprep.subr.bf16.mxu1 %v1605_v8  ;;  %v292_v40 = vld [vmem:[%s2043_s2 + $0xf8] sm:$0xff]  ;;  %v281_v43 = vld [vmem:[%s2043_s2 + $0xa0] sm:$0xff]  ;;  %v1794_v45 = vpack.c.bf16 %v288_v39, %v285_v38  ;;  %v291_v47 = vld [vmem:[%s2043_s2 + $0xf0] sm:$0xff] }
  0x1f   : > { %v284_v44 = vld [vmem:[%s2043_s2 + $0xb8] sm:$0xff]  ;;  %v1797_v46 = vpack.c.bf16 %v295_v41, %v292_v40  ;;  %v294_v48 = vld [vmem:[%s2043_s2 + $0x108] sm:$0xff]  ;;  %v301_v50 = vld [vmem:[%s2043_s2 + $0x140] sm:$0xff] }
  0x20   : > { %v298_v49 = vld [vmem:[%s2043_s2 + $0x128] sm:$0xff]  ;;  %v1812_v51 = vpack.c.bf16 %v284_v44, %v281_v43  ;;  %v287_v52 = vld [vmem:[%s2043_s2 + $0xd0] sm:$0xff]  ;;  %v1822_v54 = vpack.c.bf16 %v294_v48, %v291_v47  ;;  %v297_v56 = vld [vmem:[%s2043_s2 + $0x120] sm:$0xff] }
  0x21   : > { %1316 = vmatpush1.bf16.msra.mxu0 %v1730_v24  ;;  %1342 = vmatpush3.bf16.msra.mxu1 %v1756_v33  ;;  %v290_v53 = vld [vmem:[%s2043_s2 + $0xe8] sm:$0xff]  ;;  %v1825_v55 = vpack.c.bf16 %v301_v50, %v298_v49  ;;  %v300_v57 = vld [vmem:[%s2043_s2 + $0x138] sm:$0xff]  ;;  %v307_v59 = vld [vmem:[%s2043_s2 + $0x170] sm:$0xff] }
  0x22   : > { %1318 = vmatprep.subr.bf16.mxu0 %v1738_v27  ;;  %1343 = vmatprep.subr.bf16.mxu1 %v1605_v8  ;;  %v304_v58 = vld [vmem:[%s2043_s2 + $0x158] sm:$0xff]  ;;  %v1840_v60 = vpack.c.bf16 %v290_v53, %v287_v52  ;;  %v293_v61 = vld [vmem:[%s2043_s2 + $0x100] sm:$0xff]  ;;  %v1850_v63 = vpack.c.bf16 %v300_v57, %v297_v56  ;;  %v303_v1 = vld [vmem:[%s2043_s2 + $0x150] sm:$0xff] }
  0x23   : > { %v296_v62 = vld [vmem:[%s2043_s2 + $0x118] sm:$0xff]  ;;  %v1853_v0 = vpack.c.bf16 %v307_v59, %v304_v58  ;;  %v306_v2 = vld [vmem:[%s2043_s2 + $0x168] sm:$0xff]  ;;  %v299_v5 = vld [vmem:[%s2043_s2 + $0x130] sm:$0xff] }
  0x24   : > { %v1862_v3 = vpack.c.bf16 %v296_v62, %v293_v61  ;;  %v302_v6 = vld [vmem:[%s2043_s2 + $0x148] sm:$0xff]  ;;  %v1872_v7 = vpack.c.bf16 %v306_v2, %v303_v1  ;;  %v305_v13 = vld [vmem:[%s2043_s2 + $0x160] sm:$0xff]  ;;  %v308_v14 = vld [vmem:[%s2043_s2 + $0x178] sm:$0xff] }
  0x25   : > { %1320 = vmatpush1.bf16.msra.mxu0 %v1766_v36  ;;  %1345 = vmatpush3.bf16.msra.mxu1 %v1784_v42  ;;  %v1876_v12 = vpack.c.bf16 %v302_v6, %v299_v5  ;;  %v1886_v15 = vld [vmem:[#allocation2] sm:$0xff]  ;;  %v1890_v18 = vpack.c.bf16 %v308_v14, %v305_v13  ;;  %v318_v28 = vld [vmem:[%s1659_s27 + $0x8] sm:$0xff]  ;;  %v319_v40 = vld [vmem:[%s1659_s27 + $0x10] sm:$0xff] }
  0x26   : > { %1322 = vmatprep.subr.bf16.mxu0 %v1769_v37  ;;  %1346 = vmatprep.subr.bf16.mxu1 %v1605_v8  ;;  %v317_v19 = vld [vmem:[%s1659_s27] sm:$0xff]  ;;  %v1083_v56 = vld [vmem:[%s1659_s27 + $0x18] sm:$0xff] }
  0x27   : > { %v1937_v31 = vld [vmem:[%s2044_s3] ss:$0 sm:$0xff] }
  0x28   : > { %v1084_v2 = vld [vmem:[%s1659_s27 + $0x20] sm:$0xff] }
  0x29   : > { %1324 = vmatpush1.bf16.msra.mxu0 %v1794_v45  ;;  %1348 = vmatpush3.bf16.msra.mxu1 %v1812_v51 }
  0x2a   : > { %1326 = vmatprep.subr.bf16.mxu0 %v1797_v46  ;;  %1349 = vmatprep.subr.bf16.mxu1 %v1605_v8 }
  0x2d   : > { %1328 = vmatpush1.bf16.msra.mxu0 %v1822_v54  ;;  %1351 = vmatpush3.bf16.msra.mxu1 %v1840_v60 }
  0x2e   : > { %1330 = vmatprep.subr.bf16.mxu0 %v1825_v55  ;;  %1352 = vmatprep.subr.bf16.mxu1 %v1605_v8 }
  0x31   : > { %1332 = vmatpush1.bf16.msra.mxu0 %v1850_v63  ;;  %1354 = vmatpush3.bf16.msra.mxu1 %v1862_v3 }
  0x32   : > { %1334 = vmatprep.subr.bf16.mxu0 %v1853_v0  ;;  %1355 = vmatprep.subr.bf16.mxu1 %v1605_v8 }
  0x35   : > { %1336 = vmatpush1.bf16.msra.mxu0 %v1872_v7  ;;  %1357 = vmatpush3.bf16.msra.mxu1 %v1876_v12 }
  0x36   : > { %1362 = vmatprep.subr.bf16.mxu0 %v1673_v4  ;;  %1358 = vmatprep.subr.bf16.mxu1 %v1605_v8 }
  0x38   : > { %385 = vmatmul.mubr.f32.vlgmr.msra.gmra.mrb[0].mxu0 %v1886_v15 }
  0x39   : > { %1364 = vmatpush1.bf16.msra.mxu0 %v1686_v10  ;;  %547 = vmatprep.mubr.f32.mxu0 %v1606_v9 }
  0x3a   : > { %1366 = vmatprep.subr.bf16.mxu0 %v1688_v11  ;;  %1360 = vmatpush3.bf16.msra.mxu1 %v1890_v18 }
  0x3b   : > { %1393 = vmatprep.subr.bf16.mxu1 %v1605_v8 }
  0x3d   : > { %1368 = vmatpush1.bf16.msra.mxu0 %v1706_v16  ;;  %1198 = vmatmul.mubr.f32.vlgmr.msra.gmra.mrb[0].mxu1 %v1886_v15 }
  0x3e   : > { %1370 = vmatprep.subr.bf16.mxu0 %v1709_v17  ;;  %1395 = vmatpush3.bf16.msra.mxu1 %v1732_v25 }
  0x3f   : > { %1232 = vmatprep.mubr.msk.f32.mxu1 %vm1607_vm0, %v1606_v9  ;;  %1396 = vmatprep.subr.bf16.mxu1 %v1605_v8 }
  0x41   : > { %1372 = vmatpush1.bf16.msra.mxu0 %v1730_v24 }
  0x42   : > { %1374 = vmatprep.subr.bf16.mxu0 %v1738_v27  ;;  %1398 = vmatpush3.bf16.msra.mxu1 %v1756_v33 }
  0x43   : > { %1399 = vmatprep.subr.bf16.mxu1 %v1605_v8 }
  0x45   : > { %1376 = vmatpush1.bf16.msra.mxu0 %v1766_v36 }
  0x46   : > { %1378 = vmatprep.subr.bf16.mxu0 %v1769_v37  ;;  %1401 = vmatpush3.bf16.msra.mxu1 %v1784_v42 }
  0x47   : > { %1402 = vmatprep.subr.bf16.mxu1 %v1605_v8 }
  0x49   : > { %1380 = vmatpush1.bf16.msra.mxu0 %v1794_v45 }
  0x4a   : > { %1382 = vmatprep.subr.bf16.mxu0 %v1797_v46  ;;  %1404 = vmatpush3.bf16.msra.mxu1 %v1812_v51 }
  0x4b   : > { %1405 = vmatprep.subr.bf16.mxu1 %v1605_v8 }
  0x4d   : > { %1384 = vmatpush1.bf16.msra.mxu0 %v1822_v54 }
  0x4e   : > { %1386 = vmatprep.subr.bf16.mxu0 %v1825_v55  ;;  %1407 = vmatpush3.bf16.msra.mxu1 %v1840_v60 }
  0x4f   : > { %1408 = vmatprep.subr.bf16.mxu1 %v1605_v8 }
  0x51   : > { %1388 = vmatpush1.bf16.msra.mxu0 %v1850_v63 }
  0x52   : > { %1390 = vmatprep.subr.bf16.mxu0 %v1853_v0  ;;  %1410 = vmatpush3.bf16.msra.mxu1 %v1862_v3 }
  0x53   : > { %1411 = vmatprep.subr.bf16.mxu1 %v1605_v8 }
  0x55   : > { %1392 = vmatpush1.bf16.msra.mxu0 %v1872_v7 }
  0x56   : > { %1418 = vmatprep.subr.bf16.mxu0 %v1673_v4  ;;  %1413 = vmatpush3.bf16.msra.mxu1 %v1876_v12 }
  0x57   : > { %1414 = vmatprep.subr.bf16.mxu1 %v1605_v8 }
  0x5a   : > { %1416 = vmatpush3.bf16.msra.mxu1 %v1890_v18 }
  0x5b   : > { %1449 = vmatprep.subr.bf16.mxu1 %v1605_v8 }
 0x10b   : > { %v386_v20 = vpop.f32.mrb[0].mxu0 }
 0x10c   : > { %v461_v21 = vadd.f32 %v386_v20, %v317_v19  ;;  %v388_v22 = vpop.f32.mrb[1].mxu0  ;;  %v1085_v19 = vld [vmem:[%s1659_s27 + $0x28] sm:$0xff] }
 0x10d   : > { %v466_v30 = vadd.f32 %v388_v22, %v318_v28 }
 0x10e   : > { %v462_v23 = vmul.f32 0.5, %v461_v21 }
 0x10f   : > { %v467_v32 = vmul.f32 0.5, %v466_v30 }
 0x110   : > { %1557 = vtanh.f32 %v462_v23  ;;  %v457_v26 = vpop.f32.mrb[0].mxu1 }
 0x111   : > { %v1199_v29 = vpop.f32.mrb[1].mxu1  ;;  %v471_v38 = vadd.f32 %v1937_v31, %v457_v26  ;;  %1559 = vtanh.f32 %v467_v32 }
 0x11a   : > { %v1558_v34 = vpop.eup %1557 }
 0x11b   : > { %v464_v35 = vmul.f32 0.5, %v1558_v34  ;;  %v1560_v44 = vpop.eup %1559 }
 0x11c   : > { %v469_v47 = vmul.f32 0.5, %v1560_v44 }
 0x11d   : > { %v465_v39 = vadd.f32 0.5, %v464_v35 }
 0x11e   : > { %v470_v49 = vadd.f32 0.5, %v469_v47 }
 0x11f   : > { %v472_v41 = vmul.f32 %v471_v38, %v465_v39 }
 0x121   : > { %v473_v43 = vadd.f32 %v472_v41, %v319_v40 }
 0x123   : > { %1561 = vtanh.f32 %v473_v43  ;;  %v1092_v43 = vld [vmem:[%s1659_s27 + $0x50] sm:$0xff] }
 0x12d   : > { %v1562_v48 = vpop.eup %1561 }
 0x12e   : > { %v475_v50 = vsub.f32 %v1886_v15, %v1562_v48 }
 0x130   : > { %v476_v52 = vmul.f32 %v475_v50, %v470_v49 }
 0x132   : > { %v1942_v53 = vadd.f32 %v1562_v48, %v476_v52 }
 0x134   : > { %478 = vst [vmem:[%s1654_s24] sm:$0xff] %v1942_v53  ;;  %548 = vmatmul.mubr.f32.vlgmr.msra.gmra.mrb[2].mxu0 %v1942_v53  ;;  %1233 = vmatmul.mubr.f32.vlgmr.msra.gmra.mrb[2].mxu1 %v1942_v53 }
 0x135   : > { %1420 = vmatpush1.bf16.msra.mxu0 %v1686_v10  ;;  %1451 = vmatpush3.bf16.msra.mxu1 %v1732_v25 }
 0x136   : > { %1422 = vmatprep.subr.bf16.mxu0 %v1688_v11  ;;  %1452 = vmatprep.subr.bf16.mxu1 %v1605_v8 }
 0x137   : > { %711 = vmatprep.mubr.f32.mxu0 %v1606_v9  ;;  %1267 = vmatprep.mubr.msk.f32.mxu1 %vm1607_vm0, %v1606_v9 }
 0x139   : > { %1424 = vmatpush1.bf16.msra.mxu0 %v1706_v16  ;;  %1454 = vmatpush3.bf16.msra.mxu1 %v1756_v33 }
 0x13a   : > { %1426 = vmatprep.subr.bf16.mxu0 %v1709_v17  ;;  %1455 = vmatprep.subr.bf16.mxu1 %v1605_v8 }
 0x13d   : > { %1428 = vmatpush1.bf16.msra.mxu0 %v1730_v24  ;;  %1457 = vmatpush3.bf16.msra.mxu1 %v1784_v42 }
 0x13e   : > { %1430 = vmatprep.subr.bf16.mxu0 %v1738_v27  ;;  %1458 = vmatprep.subr.bf16.mxu1 %v1605_v8 }
 0x141   : > { %1432 = vmatpush1.bf16.msra.mxu0 %v1766_v36  ;;  %1460 = vmatpush3.bf16.msra.mxu1 %v1812_v51 }
 0x142   : > { %1434 = vmatprep.subr.bf16.mxu0 %v1769_v37  ;;  %1461 = vmatprep.subr.bf16.mxu1 %v1605_v8 }
 0x145   : > { %1436 = vmatpush1.bf16.msra.mxu0 %v1794_v45  ;;  %1463 = vmatpush3.bf16.msra.mxu1 %v1840_v60 }
 0x146   : > { %1438 = vmatprep.subr.bf16.mxu0 %v1797_v46  ;;  %1464 = vmatprep.subr.bf16.mxu1 %v1605_v8 }
 0x149   : > { %1440 = vmatpush1.bf16.msra.mxu0 %v1822_v54  ;;  %1466 = vmatpush3.bf16.msra.mxu1 %v1862_v3 }
 0x14a   : > { %1442 = vmatprep.subr.bf16.mxu0 %v1825_v55  ;;  %1467 = vmatprep.subr.bf16.mxu1 %v1605_v8 }
 0x14d   : > { %1444 = vmatpush1.bf16.msra.mxu0 %v1850_v63  ;;  %1469 = vmatpush3.bf16.msra.mxu1 %v1876_v12 }
 0x14e   : > { %1446 = vmatprep.subr.bf16.mxu0 %v1853_v0  ;;  %1470 = vmatprep.subr.bf16.mxu1 %v1605_v8 }
 0x151   : > { %1448 = vmatpush1.bf16.msra.mxu0 %v1872_v7  ;;  %1472 = vmatpush3.bf16.msra.mxu1 %v1890_v18 }
 0x152   : > { %1474 = vmatprep.subr.bf16.mxu0 %v1673_v4  ;;  %1505 = vmatprep.subr.bf16.mxu1 %v1605_v8 }
 0x207   : > { %v549_v57 = vpop.f32.mrb[2].mxu0  ;;  %v620_v58 = vpop.f32.mrb[2].mxu1 }
 0x208   : > { %v624_v59 = vadd.f32 %v1083_v56, %v549_v57  ;;  %v551_v61 = vpop.f32.mrb[3].mxu0  ;;  %v1234_v62 = vpop.f32.mrb[3].mxu1  ;;  %v634_v4 = vadd.f32 %v1937_v31, %v620_v58 }
 0x209   : > { %v629_v5 = vadd.f32 %v1084_v2, %v551_v61 }
 0x20a   : > { %v625_v1 = vmul.f32 0.5, %v624_v59 }
 0x20b   : > { %v630_v6 = vmul.f32 0.5, %v629_v5 }
 0x20c   : > { %1563 = vtanh.f32 %v625_v1 }
 0x20d   : > { %1565 = vtanh.f32 %v630_v6 }
 0x216   : > { %v1564_v13 = vpop.eup %1563 }
 0x217   : > { %v627_v14 = vmul.f32 0.5, %v1564_v13  ;;  %v1566_v22 = vpop.eup %1565 }
 0x218   : > { %v632_v23 = vmul.f32 0.5, %v1566_v22 }
 0x219   : > { %v628_v15 = vadd.f32 0.5, %v627_v14 }
 0x21a   : > { %v633_v28 = vadd.f32 0.5, %v632_v23 }
 0x21b   : > { %v635_v20 = vmul.f32 %v634_v4, %v628_v15 }
 0x21d   : > { %v636_v21 = vadd.f32 %v1085_v19, %v635_v20 }
 0x21f   : > { %1567 = vtanh.f32 %v636_v21 }
 0x229   : > { %v1568_v26 = vpop.eup %1567 }
 0x22a   : > { %v638_v29 = vsub.f32 %v1942_v53, %v1568_v26  ;;  %v1093_v53 = vld [vmem:[%s1659_s27 + $0x58] sm:$0xff] }
 0x22c   : > { %v639_v30 = vmul.f32 %v638_v29, %v633_v28 }
 0x22e   : > { %v640_v32 = vadd.f32 %v1568_v26, %v639_v30 }
 0x230   : > { %1086 = vst [vmem:[%s1654_s24 + $0x8] sm:$0xff] %v640_v32  ;;  %712 = vmatmul.mubr.f32.vlgmr.msra.gmra.mrb[4].mxu0 %v640_v32  ;;  %1268 = vmatmul.mubr.f32.vlgmr.msra.gmra.mrb[4].mxu1 %v640_v32 }
 0x231   : > { %1476 = vmatpush1.bf16.msra.mxu0 %v1686_v10  ;;  %1507 = vmatpush3.bf16.msra.mxu1 %v1732_v25 }
 0x232   : > { %1478 = vmatprep.subr.bf16.mxu0 %v1688_v11  ;;  %1508 = vmatprep.subr.bf16.mxu1 %v1605_v8 }
 0x233   : > { %875 = vmatprep.mubr.f32.mxu0 %v1606_v9  ;;  %1302 = vmatprep.mubr.msk.f32.mxu1 %vm1607_vm0, %v1606_v9  ;;  %v1087_v9 = vld [vmem:[%s1659_s27 + $0x30] sm:$0xff] }
 0x235   : > { %1480 = vmatpush1.bf16.msra.mxu0 %v1706_v16  ;;  %1510 = vmatpush3.bf16.msra.mxu1 %v1756_v33 }
 0x236   : > { %1482 = vmatprep.subr.bf16.mxu0 %v1709_v17  ;;  %1511 = vmatprep.subr.bf16.mxu1 %v1605_v8 }
 0x239   : > { %1484 = vmatpush1.bf16.msra.mxu0 %v1730_v24  ;;  %1513 = vmatpush3.bf16.msra.mxu1 %v1784_v42 }
 0x23a   : > { %1486 = vmatprep.subr.bf16.mxu0 %v1738_v27  ;;  %1514 = vmatprep.subr.bf16.mxu1 %v1605_v8  ;;  %v1088_v27 = vld [vmem:[%s1659_s27 + $0x38] sm:$0xff] }
 0x23d   : > { %1488 = vmatpush1.bf16.msra.mxu0 %v1766_v36  ;;  %1516 = vmatpush3.bf16.msra.mxu1 %v1812_v51 }
 0x23e   : > { %1490 = vmatprep.subr.bf16.mxu0 %v1769_v37  ;;  %1517 = vmatprep.subr.bf16.mxu1 %v1605_v8 }
 0x241   : > { %1492 = vmatpush1.bf16.msra.mxu0 %v1794_v45  ;;  %1519 = vmatpush3.bf16.msra.mxu1 %v1840_v60 }
 0x242   : > { %1494 = vmatprep.subr.bf16.mxu0 %v1797_v46  ;;  %1520 = vmatprep.subr.bf16.mxu1 %v1605_v8  ;;  %v1089_v46 = vld [vmem:[%s1659_s27 + $0x40] sm:$0xff] }
 0x245   : > { %1496 = vmatpush1.bf16.msra.mxu0 %v1822_v54  ;;  %1522 = vmatpush3.bf16.msra.mxu1 %v1862_v3 }
 0x246   : > { %1498 = vmatprep.subr.bf16.mxu0 %v1825_v55  ;;  %1523 = vmatprep.subr.bf16.mxu1 %v1605_v8 }
 0x249   : > { %1500 = vmatpush1.bf16.msra.mxu0 %v1850_v63  ;;  %1525 = vmatpush3.bf16.msra.mxu1 %v1876_v12 }
 0x24a   : > { %1502 = vmatprep.subr.bf16.mxu0 %v1853_v0  ;;  %1526 = vmatprep.subr.bf16.mxu1 %v1605_v8 }
 0x24d   : > { %1504 = vmatpush1.bf16.msra.mxu0 %v1872_v7  ;;  %1528 = vmatpush3.bf16.msra.mxu1 %v1890_v18  ;;  %v1091_v18 = vld [vmem:[%s1659_s27 + $0x48] sm:$0xff] }
 0x303   : > { %v713_v10 = vpop.f32.mrb[4].mxu0  ;;  %v784_v11 = vpop.f32.mrb[4].mxu1 }
 0x304   : > { %v788_v16 = vadd.f32 %v1087_v9, %v713_v10  ;;  %v715_v17 = vpop.f32.mrb[5].mxu0  ;;  %v1269_v24 = vpop.f32.mrb[5].mxu1  ;;  %v798_v45 = vadd.f32 %v1937_v31, %v784_v11 }
 0x305   : > { %v793_v33 = vadd.f32 %v1088_v27, %v715_v17 }
 0x306   : > { %v789_v25 = vmul.f32 0.5, %v788_v16 }
 0x307   : > { %v794_v36 = vmul.f32 0.5, %v793_v33 }
 0x308   : > { %1569 = vtanh.f32 %v789_v25 }
 0x309   : > { %1571 = vtanh.f32 %v794_v36 }
 0x312   : > { %v1570_v37 = vpop.eup %1569 }
 0x313   : > { %v791_v42 = vmul.f32 0.5, %v1570_v37  ;;  %v1572_v55 = vpop.eup %1571 }
 0x314   : > { %v796_v60 = vmul.f32 0.5, %v1572_v55 }
 0x315   : > { %v792_v8 = vadd.f32 0.5, %v791_v42 }
 0x316   : > { %v797_v0 = vadd.f32 0.5, %v796_v60 }
 0x317   : > { %v799_v51 = vmul.f32 %v798_v45, %v792_v8 }
 0x319   : > { %v800_v54 = vadd.f32 %v1089_v46, %v799_v51 }
 0x31b   : > { %1573 = vtanh.f32 %v800_v54 }
 0x325   : > { %v1574_v63 = vpop.eup %1573 }
 0x326   : > { %v802_v3 = vsub.f32 %v640_v32, %v1574_v63 }
 0x328   : > { %v803_v7 = vmul.f32 %v802_v3, %v797_v0 }
 0x32a   : > { %v804_v12 = vadd.f32 %v1574_v63, %v803_v7 }
 0x32c   : > { %1090 = vst [vmem:[%s1654_s24 + $0x10] sm:$0xff] %v804_v12  ;;  %876 = vmatmul.mubr.f32.vlgmr.msra.gmra.mrb[6].mxu0 %v804_v12  ;;  %1303 = vmatmul.mubr.f32.vlgmr.msra.gmra.mrb[6].mxu1 %v804_v12 }
 0x3ff   : > { %v877_v34 = vpop.f32.mrb[6].mxu0  ;;  %v948_v35 = vpop.f32.mrb[6].mxu1 }
 0x400   : > { %v952_v38 = vadd.f32 %v1091_v18, %v877_v34  ;;  %v879_v39 = vpop.f32.mrb[7].mxu0  ;;  %v1304_v40 = vpop.f32.mrb[7].mxu1  ;;  %v962_v52 = vadd.f32 %v1937_v31, %v948_v35 }
 0x401   : > { %v957_v44 = vadd.f32 %v1092_v43, %v879_v39 }
 0x402   : > { %v953_v41 = vmul.f32 0.5, %v952_v38 }
 0x403   : > { %v958_v47 = vmul.f32 0.5, %v957_v44 }
 0x404   : > { %1575 = vtanh.f32 %v953_v41 }
 0x405   : > { %1577 = vtanh.f32 %v958_v47 }
 0x40e   : > { %v1576_v48 = vpop.eup %1575 }
 0x40f   : > { %v955_v49 = vmul.f32 0.5, %v1576_v48  ;;  %v1578_v58 = vpop.eup %1577 }
 0x410   : > { %v960_v59 = vmul.f32 0.5, %v1578_v58 }
 0x411   : > { %v956_v50 = vadd.f32 0.5, %v955_v49 }
 0x412   : > { %v961_v62 = vadd.f32 0.5, %v960_v59 }
 0x413   : > { %v963_v56 = vmul.f32 %v962_v52, %v956_v50 }
 0x415   : > { %v964_v57 = vadd.f32 %v1093_v53, %v963_v56 }
 0x417   : > { %1579 = vtanh.f32 %v964_v57 }
 0x421   : > { %v1580_v61 = vpop.eup %1579 }
 0x422   : > { %v966_v1 = vsub.f32 %v804_v12, %v1580_v61 }
 0x424   : > { %v967_v2 = vmul.f32 %v966_v1, %v961_v62 }
 0x426   : > { %v968_v5 = vadd.f32 %v1580_v61, %v967_v2 }
 0x428   : > { %1094 = vst [vmem:[%s1654_s24 + $0x18] sm:$0xff] %v968_v5  ;;  %971 = vst [vmem:[#allocation2] sm:$0xff] %v968_v5 }
 0x429 PF: > { %s14_s17 = sadd.s32 1, %s1603_s17   ;;  %s2046_s15 = smov %s1599_s16 }
 0x42a   : > { %p11_p6 = scmp.ge.s32.totalorder %s14_s17, 5   ;;  %s2047_s16 = smov %s2049_s18 }
 0x42c   :  { %13 = sbr.rel (!%p11_p6) target bundleno = 2 (0x2), region = 79 }

</bundles_post_ra>
